<compile_context>
chip_gen: v7x
topology: tpu7x:2x2x1
jax: 0.10.0
libtpu: 0.0.40
codegen_flags: <defaults>
</compile_context>

<pallas_src>
import jax
import jax.numpy as jnp
from jax.experimental import pallas as pl
from jax.experimental.pallas import tpu as pltpu

_LANE_CANDIDATES = (1024, 512, 256, 128)   # lane-dense widths (multiples of 128)
_RAGGED_LANE = 1024                        # fallback lane for ragged sizes
_MAX_BLOCK_BYTES = 8 * 1024 * 1024         # per pipeline buffer
_MEGACORE_SPLIT_BYTES = 1 * 1024 * 1024    # split into >=2 grid steps above this


def _swish_kernel(x_ref, o_ref):
    x = x_ref[...].astype(jnp.float32)
    # sigmoid(x) == 0.5 * (tanh(0.5 * x) + 1)  ->  one EUP transcendental/elem.
    sig = 0.5 * (jnp.tanh(0.5 * x) + 1.0)
    o_ref[...] = (x * sig).astype(o_ref.dtype)


def _round_up(n, m):
    return ((n + m - 1) // m) * m


def _sublane(dtype):
    # packed dtypes need taller minimum sublane tiles
    return {4: 8, 2: 16, 1: 32}.get(jnp.dtype(dtype).itemsize, 8)


def _vmem_capacity_bytes():
    try:
        cap = getattr(pltpu.get_tpu_info(), "vmem_capacity_bytes", None)
        if cap:
            return int(cap)
    except Exception:
        pass
    return 64 * 1024 * 1024                # conservative: v7x per-core VMEM


def swish(x):
    """Elementwise Swish: x * sigmoid(x). Accepts any shape / dtype."""
    orig_shape = x.shape
    n = x.size
    if n == 0:
        return x

    itemsize = jnp.dtype(x.dtype).itemsize
    sublane = _sublane(x.dtype)

    # Lane-dense layout: widest lane width (multiple of 128) dividing n exactly
    # -> no pad, no output slice on the common path.
    lane = next((c for c in _LANE_CANDIDATES if n % c == 0), None)
    ragged = lane is None
    if ragged:
        lane = _RAGGED_LANE

    rows = pl.cdiv(n, lane)
    flat = x.reshape(-1)
    if ragged:
        flat = jnp.pad(flat, (0, rows * lane - n))   # swish(0)==0; tail sliced off
    x2 = flat.reshape(rows, lane)

    # Row tiling: biggest tile keeping 2-in + 2-out double buffers under half
    # of physical VMEM (and <= 8 MiB per buffer).
    vmem_bytes = _vmem_capacity_bytes()
    row_bytes = lane * itemsize
    max_block_bytes = min(vmem_bytes // 8, _MAX_BLOCK_BYTES)
    tm_cap = max(sublane, (max_block_bytes // row_bytes) // sublane * sublane)

    if rows > tm_cap:
        tm = tm_cap
    elif rows >= 2 * sublane and rows * row_bytes >= _MEGACORE_SPLIT_BYTES:
        # >= 2 grid steps so the "parallel" axis shards across v7x's 2 cores.
        tm = _round_up(pl.cdiv(rows, 2), sublane)
    else:
        tm = rows                                    # single full-array block

    grid = pl.cdiv(rows, tm)
    pipeline_bytes = 4 * tm * row_bytes              # 2 input + 2 output buffers
    vmem_limit = int(min(vmem_bytes * 3 // 4,
                         max(32 * 1024 * 1024, pipeline_bytes + (16 << 20))))

    out = pl.pallas_call(
        _swish_kernel,
        out_shape=jax.ShapeDtypeStruct((rows, lane), x.dtype),
        grid_spec=pl.GridSpec(
            grid=(grid,),
            in_specs=[pl.BlockSpec((tm, lane), lambda i: (i, 0))],
            out_specs=pl.BlockSpec((tm, lane), lambda i: (i, 0)),
        ),
        compiler_params=pltpu.CompilerParams(
            dimension_semantics=("parallel",),
            vmem_limit_bytes=vmem_limit,
        ),
    )(x2)

    if ragged:
        return out.reshape(-1)[:n].reshape(orig_shape)
    return out.reshape(orig_shape)


def _ref_swish(x):
    xf = x.astype(jnp.float32)
    return (xf * jax.nn.sigmoid(xf)).astype(x.dtype)


if __name__ == "__main__":
    key = jax.random.PRNGKey(0)

    # Small shape consistent with the Conformer activations: batch=2, seq=8, hidden=32.
    B, S, H = 2, 8, 32
    x = jax.random.normal(key, (B, S, H), dtype=jnp.float32)
    y = jax.block_until_ready(swish(x))
    assert y.shape == x.shape
    assert jnp.allclose(y, _ref_swish(x), atol=1e-5, rtol=1e-5), "mismatch (small)"

    # Extra sanity check exercising the multi-block / megacore-split path.
    x2 = jax.random.normal(jax.random.PRNGKey(1), (8, 128, 1024), dtype=jnp.float32)
    y2 = jax.block_until_ready(swish(x2))
    assert y2.shape == x2.shape
    assert jnp.allclose(y2, _ref_swish(x2), atol=1e-5, rtol=1e-5), "mismatch (tiled)"

    print("KERNEL_OK")
</pallas_src>

<mosaic_0001>
module attributes {stable_mosaic.version = 11 : i64} {
  func.func @_swish_kernel(%arg0: i32, %arg1: memref<1x512xf32, #tpu.memory_space<vmem>>, %arg2: memref<1x512xf32, #tpu.memory_space<vmem>>) attributes {dimension_semantics = [#tpu.dimension_semantics<parallel>], iteration_bounds = array<i64: 1>, scalar_prefetch = 0 : i64, scratch_operands = 0 : i64, tpu.core_type = #tpu.core_type<tc>, window_params = [{transform_indices = @transform_0, window_bounds = array<i64: 1, 512>}, {transform_indices = @transform_1, window_bounds = array<i64: 1, 512>}]} {
    %c0 = arith.constant 0 : index
    %c0_0 = arith.constant 0 : index
    %0 = vector.load %arg1[%c0, %c0_0] : memref<1x512xf32, #tpu.memory_space<vmem>>, vector<1x512xf32>
    %cst = arith.constant 5.000000e-01 : f32
    %1 = vector.broadcast %cst : f32 to vector<1x512xf32>
    %2 = arith.mulf %1, %0 : vector<1x512xf32>
    %3 = math.tanh %2 : vector<1x512xf32>
    %cst_1 = arith.constant 1.000000e+00 : f32
    %4 = vector.broadcast %cst_1 : f32 to vector<1x512xf32>
    %5 = arith.addf %3, %4 : vector<1x512xf32>
    %cst_2 = arith.constant 5.000000e-01 : f32
    %6 = vector.broadcast %cst_2 : f32 to vector<1x512xf32>
    %7 = arith.mulf %6, %5 : vector<1x512xf32>
    %8 = arith.mulf %0, %7 : vector<1x512xf32>
    %c0_3 = arith.constant 0 : index
    %c0_4 = arith.constant 0 : index
    %9 = vector.load %arg2[%c0_3, %c0_4] : memref<1x512xf32, #tpu.memory_space<vmem>>, vector<1x512xf32>
    tpu.vector_store %arg2[%c0_3, %c0_4], %8 {strides = array<i32>} : memref<1x512xf32, #tpu.memory_space<vmem>>, vector<1x512xf32>,
    return
  }
  func.func @transform_0(%arg0: i32) -> (i32, i32) {
    %c0_i32 = arith.constant 0 : i32
    %c0_i32_0 = arith.constant 0 : i32
    return %arg0, %c0_i32 : i32, i32
  }
  func.func @transform_1(%arg0: i32) -> (i32, i32) {
    %c0_i32 = arith.constant 0 : i32
    %c0_i32_0 = arith.constant 0 : i32
    return %arg0, %c0_i32 : i32, i32
  }
}

</mosaic_0001>

<bundles_post_ra>
// kernel: tpu_custom_call.1
= control target key start
LH: loop header
LB: loop body
LE: loop exit
PB: predicated region body
PF: predicated region fallthrough
CT: control target
= control target key end

     0   :  { %6 = vsyncpa [#allocation3], 0  ;;  %s135_s0 = inlined_call_operand.hbm [shape: f32[1,512], index: 0, kind: input, shape index: {}]   ;;  %s136_s1 = inlined_call_operand.hbm [shape: f32[1,512], index: 1, kind: output, shape index: {}]  }
   0x1   :  { %7 = vsyncpa [#allocation4], 0  ;;  %s99_s6 = smov [#allocation2]   ;;  %s51_s10 = scalar_lea.hbm %s135_s0, 64 }
   0x2   :  { %s14_s7 = sshll.u32 %s99_s6, 4  ;;  %p52_p0 = scmp.ne.s32.totalorder %s135_s0, %s51_s10  ;;  %s15_s7 = int_to_ptr.vmem [resolvable:$true] %s14_s7 }
   0x3   :  { %p55_p1 = scmp.lt.u32.totalorder %s51_s10, %s135_s0 }
   0x5   :  { %p57_p2 = pnand %p55_p1, %p52_p0 }
   0x7   :  { %60 = shalt.err (!%p57_p2)
}
   0x8   :  { %s61_s15 = scalar_lea.vmem %s15_s7, 64  ;;  %p66_p4 = scmp.lt.s32.totalorder %s15_s7, %s15_s7 }
   0x9   :  { %p62_p3 = scmp.ne.s32.totalorder %s15_s7, %s61_s15  ;;  %p67_p5 = scmp.lt.s32.totalorder %s61_s15, %s61_s15 }
   0xb   :  { %p68_p6 = por %p67_p5, %p66_p4 }
   0xd   :  { %p69_p7 = pnand %p68_p6, %p62_p3 }
   0xf   :  { %72 = shalt.err (!%p69_p7)
}
  0x10   :  { %17 = dma.hbm_to_vmem [thread:$0]  %s135_s0, 64, %s15_s7, [#allocation3]  }
  0x11   :  { %95 = dma.done.wait [#allocation3], 64  }
  0x12   :  { %96 = vsyncadd [#allocation3], 4294967232  ;;  %v21_v0 = vld [vmem:[#allocation2] sm:$0xf]  ;;  %v27_v3 = vlaneseq  ;;  %s100_s18 = smov [#allocation5]  }
  0x13   :  { %v22_v1 = vmul.f32 0.5, %v21_v0  ;;  %s38_s19 = sshll.u32 %s100_s18, 4  ;;  %s39_s19 = int_to_ptr.vmem [resolvable:$true] %s38_s19 }
  0x14   :  { %vm29_vm0 = vcmp.lt.s32.totalorder %v27_v3, 512  ;;  %s73_s20 = scalar_lea.vmem %s39_s19, 64  ;;  %p78_p9 = scmp.lt.s32.totalorder %s39_s19, %s39_s19 }
  0x15   :  { %49 = vtanh.f32 %v22_v1  ;;  %p74_p8 = scmp.ne.s32.totalorder %s39_s19, %s73_s20  ;;  %p79_p10 = scmp.lt.s32.totalorder %s73_s20, %s73_s20 }
  0x17   :  { %p80_p11 = por %p79_p10, %p78_p9 }
  0x19   :  { %p81_p12 = pnand %p80_p11, %p74_p8 }
  0x1f   :  { %v50_v2 = vpop.eup %49 }
  0x20   :  { %v24_v4 = vadd.f32 1.0, %v50_v2 }
  0x22   :  { %v25_v5 = vmul.f32 0.5, %v24_v4 }
  0x24   :  { %v26_v6 = vmul.f32 %v25_v5, %v21_v0 }
  0x26   :  { %31 = vst.msk [vmem:[#allocation5] sm:$0xf] %vm29_vm0, %v26_v6 }
  0x27   :  { %84 = shalt.err (!%p81_p12)
}
  0x28   :  { %s85_s22 = scalar_lea.hbm %s136_s1, 64 }
  0x29   :  { %p86_p13 = scmp.ne.s32.totalorder %s136_s1, %s85_s22  ;;  %p89_p0 = scmp.lt.u32.totalorder %s85_s22, %s136_s1 }
  0x2b   :  { %p91_p1 = pnand %p89_p0, %p86_p13 }
  0x2d   :  { %94 = shalt.err (!%p91_p1)
}
  0x2e   :  { %41 = dma.vmem_to_hbm [thread:$0]  %s39_s19, 64, %s136_s1, [#allocation4]  }
  0x2f   :  { %97 = dma.done.wait [#allocation4], 64  }
  0x30   :  { %98 = vsyncadd [#allocation4], 4294967232 }
  0x31   :  { %45 = vsyncpa [#allocation3], 1 }
  0x32   :  { %46 = vsyncpa [#allocation4], 1 }

</bundles_post_ra>
